<compile_context>
chip_gen: v7x
topology: tpu7x:2x2x1
jax: 0.10.0
libtpu: 0.0.40
codegen_flags: <defaults>
</compile_context>

<pallas_src>
import functools

import jax
import jax.numpy as jnp
from jax.experimental import pallas as pl
from jax.experimental.pallas import tpu as pltpu


def _make_mlp_kernel(n_hidden_layer: int, layer0_in_dim: int, dim_hidden: int):
    """Fused MLP kernel.

    Refs:
      x_ref    : (B, layer0_in_dim)  f32   input (unpadded)
      wh_ref   : (n_hidden, dh, dh)  bf16  hidden weights, stored (in, out)
      vecs_ref : (n_hidden+2, dh)    f32   rows 0..n_hidden-1 = hidden biases,
                                           row n_hidden       = output weight row,
                                           row n_hidden+1     = [b_out, 0, ...]
      o_ref    : (B, 1)              f32   output
    """

    def kernel(x_ref, wh_ref, vecs_ref, o_ref):
        vecs = vecs_ref[...]                 # one vld for all biases / w_out / b_out
        h = x_ref[...]                       # (B, layer0_in_dim) f32
        for i in range(n_hidden_layer):
            w = wh_ref[i]                    # (dh, dh) bf16, static index
            if i == 0 and layer0_in_dim < dim_hidden:
                w = w[:layer0_in_dim, :]     # static slice; drops padded zero rows
            b = vecs[i:i + 1, :]             # (1, dh) f32, static slice of hoisted vecs
            # bf16 x bf16 on the MXU, f32 accumulate; bias/ReLU in f32 (v5e-safe).
            h = jnp.dot(h.astype(jnp.bfloat16), w,
                        preferred_element_type=jnp.float32) + b
            h = jnp.maximum(h, 0.0)
        # Final dh -> 1 projection on the VPU (no MXU push / masked MRF drain).
        w_out = vecs[n_hidden_layer:n_hidden_layer + 1, :]          # (1, dh)
        b_out = vecs[n_hidden_layer + 1:n_hidden_layer + 2, 0:1]    # (1, 1)
        o_ref[...] = jnp.sum(h * w_out, axis=-1, keepdims=True) + b_out

    return kernel


def mynet_forward(x, wh, vecs, *, n_hidden_layer: int, dim_hidden: int):
    """x: (B, D_in) f32. wh: (n_hidden, dh, dh) bf16. vecs: (n_hidden+2, dh) f32."""
    batch, input_dim = x.shape

    if input_dim < dim_hidden and input_dim % 16 != 0:
        # Awkward sub-tile first-layer contraction (bf16 sublane pack is 16 rows):
        # fall back to zero-padding x up to dim_hidden (the packed weight's extra
        # rows are zero, so the result is unchanged).
        x = jnp.pad(x, ((0, 0), (0, dim_hidden - input_dim)))
        input_dim = dim_hidden

    kernel = _make_mlp_kernel(n_hidden_layer, input_dim, dim_hidden)

    # Advisory cost so XLA can schedule/overlap this tiny custom call.
    flops = (2 * batch * input_dim * dim_hidden
             + 2 * batch * dim_hidden * dim_hidden * max(n_hidden_layer - 1, 0)
             + 2 * batch * dim_hidden)
    bytes_accessed = (x.size * 4 + wh.size * 2 + vecs.size * 4 + batch * 4)
    cost = pl.CostEstimate(flops=flops, transcendentals=0,
                           bytes_accessed=bytes_accessed)

    TB = 128
    if batch >= 256 and batch % TB == 0:
        # Large batch: leading "parallel" batch axis so v7x's two TensorCores both
        # get work (weights/vecs stay resident, index_maps return block 0).
        grid = (batch // TB,)
        in_specs = [
            pl.BlockSpec((TB, input_dim), lambda b: (b, 0)),
            pl.BlockSpec(wh.shape, lambda b: (0, 0, 0)),
            pl.BlockSpec(vecs.shape, lambda b: (0, 0)),
        ]
        out_specs = pl.BlockSpec((TB, 1), lambda b: (b, 0))
        compiler_params = pltpu.CompilerParams(dimension_semantics=("parallel",))
    else:
        # Whole problem is a few KB: single grid point, full-array blocks
        # (full-extent last-two dims satisfies the (8,128) tiling rule).
        grid = ()
        in_specs = [
            pl.BlockSpec(x.shape, lambda: (0, 0)),
            pl.BlockSpec(wh.shape, lambda: (0, 0, 0)),
            pl.BlockSpec(vecs.shape, lambda: (0, 0)),
        ]
        out_specs = pl.BlockSpec((batch, 1), lambda: (0, 0))
        compiler_params = None

    return pl.pallas_call(
        kernel,
        out_shape=jax.ShapeDtypeStruct((batch, 1), jnp.float32),
        grid=grid,
        in_specs=in_specs,
        out_specs=out_specs,
        compiler_params=compiler_params,
        cost_estimate=cost,
    )(x, wh, vecs)


def init_mynet_params(key, input_dim: int, n_hidden_layer: int, dim_hidden: int):
    """Deterministic PyTorch-style (uniform +-1/sqrt(fan_in)) init.
    Returns flat list [w1, b1, ..., w_out, b_out]; weights stored (in, out)."""
    params = []
    dims = []
    d = input_dim
    for _ in range(n_hidden_layer):
        dims.append((d, dim_hidden))
        d = dim_hidden
    dims.append((d, 1))  # output layer

    for (fan_in, fan_out) in dims:
        key, kw, kb = jax.random.split(key, 3)
        bound = 1.0 / jnp.sqrt(jnp.float32(fan_in))
        w = jax.random.uniform(kw, (fan_in, fan_out), jnp.float32,
                               minval=-bound, maxval=bound)
        b = jax.random.uniform(kb, (1, fan_out), jnp.float32,
                               minval=-bound, maxval=bound)
        params.extend([w, b])
    return params


def pack_mynet_params(params, input_dim: int, n_hidden_layer: int, dim_hidden: int):
    """Pack flat params into the 2 kernel operands.

    Returns:
      wh   : (n_hidden, dh, dh) bf16  hidden weights (first layer zero-padded in rows)
      vecs : (n_hidden+2, dh)   f32   hidden biases + output-weight row + b_out row
    """
    assert 1 <= n_hidden_layer, "packing expects at least one hidden layer"
    assert input_dim <= dim_hidden, "first layer padded up to dim_hidden"

    ws, bs = [], []
    idx = 0
    for layer in range(n_hidden_layer):
        w, b = params[idx], params[idx + 1]
        idx += 2
        if layer == 0 and input_dim < dim_hidden:
            w = jnp.pad(w, ((0, dim_hidden - input_dim), (0, 0)))
        ws.append(w)
        bs.append(jnp.reshape(b, (1, dim_hidden)))
    w_out, b_out = params[idx], params[idx + 1]          # (dh, 1), (1, 1)

    wh = jnp.stack(ws, axis=0).astype(jnp.bfloat16)       # (n_hidden, dh, dh)
    b_out_row = jnp.zeros((1, dim_hidden), jnp.float32).at[0, 0].set(
        jnp.reshape(b_out, ()))
    vecs = jnp.concatenate(
        bs + [jnp.reshape(w_out, (1, dim_hidden)), b_out_row], axis=0)
    return wh, vecs.astype(jnp.float32)


def mynet_reference(x, params, n_hidden_layer: int):
    """Pure-JAX reference mirroring the kernel's bf16-MXU quantization:
    matmul operands rounded to bf16, accumulation in f32, final layer in f32."""
    h = x
    idx = 0
    for _ in range(n_hidden_layer):
        w, b = params[idx], params[idx + 1]
        idx += 2
        hq = h.astype(jnp.bfloat16).astype(jnp.float32)
        wq = w.astype(jnp.bfloat16).astype(jnp.float32)
        h = jnp.maximum(
            jnp.dot(hq, wq, precision=jax.lax.Precision.HIGHEST) + b, 0.0)
    w, b = params[idx], params[idx + 1]                   # (dh, 1), (1, 1)
    return jnp.sum(h * jnp.reshape(w, (1, -1)), axis=-1, keepdims=True) + b


if __name__ == "__main__":
    # MyNet(input_shape=(B, 32), n_hidden_layer=3, dim_hidden_layer=32)
    batch = 8
    input_dim = 32
    n_hidden_layer = 3
    dim_hidden = 32

    key = jax.random.PRNGKey(0)
    key, kx = jax.random.split(key)
    x = jax.random.normal(kx, (batch, input_dim), jnp.float32)

    params = init_mynet_params(key, input_dim, n_hidden_layer, dim_hidden)
    wh, vecs = pack_mynet_params(params, input_dim, n_hidden_layer, dim_hidden)

    fwd = jax.jit(functools.partial(
        mynet_forward, n_hidden_layer=n_hidden_layer, dim_hidden=dim_hidden))
    out = jax.block_until_ready(fwd(x, wh, vecs))

    ref = mynet_reference(x, params, n_hidden_layer)
    assert out.shape == (batch, 1), out.shape
    assert jnp.allclose(out, ref, atol=1e-4, rtol=1e-4), "mismatch vs reference"

    print("KERNEL_OK")
</pallas_src>

<mosaic_0001>
module attributes {stable_mosaic.version = 11 : i64} {
  func.func @kernel(%arg0: memref<8x32xf32, #tpu.memory_space<vmem>>, %arg1: memref<3x32x32xbf16, #tpu.memory_space<vmem>>, %arg2: memref<5x32xf32, #tpu.memory_space<vmem>>, %arg3: memref<8x1xf32, #tpu.memory_space<vmem>>) attributes {dimension_semantics = [], scalar_prefetch = 0 : i64, scratch_operands = 0 : i64, tpu.core_type = #tpu.core_type<tc>} {
    %c0 = arith.constant 0 : index
    %c0_0 = arith.constant 0 : index
    %0 = vector.load %arg2[%c0, %c0_0] : memref<5x32xf32, #tpu.memory_space<vmem>>, vector<5x32xf32>
    %c0_1 = arith.constant 0 : index
    %c0_2 = arith.constant 0 : index
    %1 = vector.load %arg0[%c0_1, %c0_2] : memref<8x32xf32, #tpu.memory_space<vmem>>, vector<8x32xf32>
    %c0_3 = arith.constant 0 : index
    %c0_4 = arith.constant 0 : index
    %c0_5 = arith.constant 0 : index
    %2 = vector.load %arg1[%c0_3, %c0_4, %c0_5] : memref<3x32x32xbf16, #tpu.memory_space<vmem>>, vector<1x32x32xbf16>
    %3 = vector.shape_cast %2 : vector<1x32x32xbf16> to vector<32x32xbf16>
    %4 = vector.extract_strided_slice %0 {offsets = [0, 0], sizes = [1, 32], strides = [1, 1]} : vector<5x32xf32> to vector<1x32xf32>
    %5 = arith.truncf %1 : vector<8x32xf32> to vector<8x32xbf16>
    %cst = arith.constant dense<0.000000e+00> : vector<8x32xf32>
    %6 = tpu.matmul %5, %3, %cst {dimension_numbers = #tpu.dot_dimension_numbers<[1], [0], [0], [1], [0, 0, 1, 1], [], []>} : vector<8x32xbf16>, vector<32x32xbf16>, vector<8x32xf32> -> vector<8x32xf32>
    %7 = vector.broadcast %4 : vector<1x32xf32> to vector<8x32xf32>
    %8 = arith.addf %6, %7 : vector<8x32xf32>
    %cst_6 = arith.constant 0.000000e+00 : f32
    %9 = vector.broadcast %cst_6 : f32 to vector<8x32xf32>
    %10 = arith.maximumf %8, %9 : vector<8x32xf32>
    %c1 = arith.constant 1 : index
    %c0_7 = arith.constant 0 : index
    %c0_8 = arith.constant 0 : index
    %11 = vector.load %arg1[%c1, %c0_7, %c0_8] : memref<3x32x32xbf16, #tpu.memory_space<vmem>>, vector<1x32x32xbf16>
    %12 = vector.shape_cast %11 : vector<1x32x32xbf16> to vector<32x32xbf16>
    %13 = vector.extract_strided_slice %0 {offsets = [1, 0], sizes = [1, 32], strides = [1, 1]} : vector<5x32xf32> to vector<1x32xf32>
    %14 = arith.truncf %10 : vector<8x32xf32> to vector<8x32xbf16>
    %cst_9 = arith.constant dense<0.000000e+00> : vector<8x32xf32>
    %15 = tpu.matmul %14, %12, %cst_9 {dimension_numbers = #tpu.dot_dimension_numbers<[1], [0], [0], [1], [0, 0, 1, 1], [], []>} : vector<8x32xbf16>, vector<32x32xbf16>, vector<8x32xf32> -> vector<8x32xf32>
    %16 = vector.broadcast %13 : vector<1x32xf32> to vector<8x32xf32>
    %17 = arith.addf %15, %16 : vector<8x32xf32>
    %cst_10 = arith.constant 0.000000e+00 : f32
    %18 = vector.broadcast %cst_10 : f32 to vector<8x32xf32>
    %19 = arith.maximumf %17, %18 : vector<8x32xf32>
    %c2 = arith.constant 2 : index
    %c0_11 = arith.constant 0 : index
    %c0_12 = arith.constant 0 : index
    %20 = vector.load %arg1[%c2, %c0_11, %c0_12] : memref<3x32x32xbf16, #tpu.memory_space<vmem>>, vector<1x32x32xbf16>
    %21 = vector.shape_cast %20 : vector<1x32x32xbf16> to vector<32x32xbf16>
    %22 = vector.extract_strided_slice %0 {offsets = [2, 0], sizes = [1, 32], strides = [1, 1]} : vector<5x32xf32> to vector<1x32xf32>
    %23 = arith.truncf %19 : vector<8x32xf32> to vector<8x32xbf16>
    %cst_13 = arith.constant dense<0.000000e+00> : vector<8x32xf32>
    %24 = tpu.matmul %23, %21, %cst_13 {dimension_numbers = #tpu.dot_dimension_numbers<[1], [0], [0], [1], [0, 0, 1, 1], [], []>} : vector<8x32xbf16>, vector<32x32xbf16>, vector<8x32xf32> -> vector<8x32xf32>
    %25 = vector.broadcast %22 : vector<1x32xf32> to vector<8x32xf32>
    %26 = arith.addf %24, %25 : vector<8x32xf32>
    %cst_14 = arith.constant 0.000000e+00 : f32
    %27 = vector.broadcast %cst_14 : f32 to vector<8x32xf32>
    %28 = arith.maximumf %26, %27 : vector<8x32xf32>
    %29 = vector.extract_strided_slice %0 {offsets = [3, 0], sizes = [1, 32], strides = [1, 1]} : vector<5x32xf32> to vector<1x32xf32>
    %30 = vector.extract_strided_slice %0 {offsets = [4, 0], sizes = [1, 1], strides = [1, 1]} : vector<5x32xf32> to vector<1x1xf32>
    %31 = vector.broadcast %29 : vector<1x32xf32> to vector<8x32xf32>
    %32 = arith.mulf %28, %31 : vector<8x32xf32>
    %cst_15 = arith.constant dense<0.000000e+00> : vector<8xf32>
    %33 = vector.multi_reduction <add>, %32, %cst_15 [1] : vector<8x32xf32> to vector<8xf32>
    %34 = vector.shape_cast %33 : vector<8xf32> to vector<8x1xf32>
    %35 = vector.broadcast %30 : vector<1x1xf32> to vector<8x1xf32>
    %36 = arith.addf %34, %35 : vector<8x1xf32>
    %c0_16 = arith.constant 0 : index
    %c0_17 = arith.constant 0 : index
    %37 = vector.load %arg3[%c0_16, %c0_17] : memref<8x1xf32, #tpu.memory_space<vmem>>, vector<8x1xf32>
    tpu.vector_store %arg3[%c0_16, %c0_17], %36 {strides = array<i32>} : memref<8x1xf32, #tpu.memory_space<vmem>>, vector<8x1xf32>,
    return
  }
}

</mosaic_0001>

<bundles_post_ra>
// kernel: mynet_forward.1
= control target key start
LH: loop header
LB: loop body
LE: loop exit
PB: predicated region body
PF: predicated region fallthrough
CT: control target
= control target key end

     0   :  { %8 = vsyncpa [#allocation3], 0  ;;  %s468_s0 = inlined_call_operand.hbm [shape: f32[8,32], index: 0, kind: input, shape index: {}]   ;;  %s469_s1 = inlined_call_operand.hbm [shape: bf16[3,32,32], index: 1, kind: input, shape index: {}]   ;;  %s470_s2 = inlined_call_operand.hbm [shape: f32[5,32], index: 2, kind: input, shape index: {}]   ;;  %s471_s3 = inlined_call_operand.vmem [shape: f32[8,1], index: 3, kind: output, shape index: {}]  }
   0x1   :  { %9 = vsyncpa [#allocation5], 0  ;;  %s398_s12 = smov [#allocation4]   ;;  %s328_s16 = scalar_lea.hbm %s469_s1, 768 }
   0x2   :  { %s25_s13 = sshll.u32 %s398_s12, 4  ;;  %p329_p0 = scmp.ne.s32.totalorder %s469_s1, %s328_s16  ;;  %s26_s13 = int_to_ptr.vmem [resolvable:$true] %s25_s13 }
   0x3   :  { %p332_p1 = scmp.lt.u32.totalorder %s328_s16, %s469_s1 }
   0x5   :  { %p334_p2 = pnand %p332_p1, %p329_p0 }
   0x7   :  { %337 = shalt.err (!%p334_p2)
}
   0x8   :  { %s338_s21 = scalar_lea.vmem %s26_s13, 768  ;;  %p343_p4 = scmp.lt.s32.totalorder %s26_s13, %s26_s13 }
   0x9   :  { %p339_p3 = scmp.ne.s32.totalorder %s26_s13, %s338_s21  ;;  %p344_p5 = scmp.lt.s32.totalorder %s338_s21, %s338_s21 }
   0xb   :  { %p345_p6 = por %p344_p5, %p343_p4 }
   0xd   :  { %p346_p7 = pnand %p345_p6, %p339_p3 }
   0xf   :  { %349 = shalt.err (!%p346_p7)
}
  0x10   :  { %s399_s22 = smov 64   ;;  %s400_s23 = smov 4  }
  0x11   :  { %31 = dma.hbm_to_vmem [thread:$0]  %s469_s1, 768, %s26_s13, [#allocation5], %s399_s22, %s399_s22, %s400_s23  }
  0x12   :  { %s401_s26 = smov [#allocation2]   ;;  %s402_s28 = smov [#allocation6]  }
  0x13   :  { %s16_s27 = sshll.u32 %s401_s26, 4  ;;  %s38_s29 = sshll.u32 %s402_s28, 4  ;;  %s17_s27 = int_to_ptr.vmem [resolvable:$true] %s16_s27  ;;  %s39_s29 = int_to_ptr.vmem [resolvable:$true] %s38_s29 }
  0x14   :  { %s350_s5 = scalar_lea.hbm %s468_s0, 128 }
  0x15   :  { %p351_p8 = scmp.ne.s32.totalorder %s468_s0, %s350_s5  ;;  %p354_p9 = scmp.lt.u32.totalorder %s350_s5, %s468_s0 }
  0x17   :  { %p356_p10 = pnand %p354_p9, %p351_p8 }
  0x19   :  { %359 = shalt.err (!%p356_p10)
}
  0x1a   :  { %s360_s1 = scalar_lea.vmem %s17_s27, 128  ;;  %p365_p12 = scmp.lt.s32.totalorder %s17_s27, %s17_s27 }
  0x1b   :  { %p361_p11 = scmp.ne.s32.totalorder %s17_s27, %s360_s1  ;;  %p366_p13 = scmp.lt.s32.totalorder %s360_s1, %s360_s1 }
  0x1d   :  { %p367_p0 = por %p366_p13, %p365_p12 }
  0x1f   :  { %p368_p1 = pnand %p367_p0, %p361_p11 }
  0x21   :  { %371 = shalt.err (!%p368_p1)
}
  0x22   :  { %19 = dma.hbm_to_vmem [thread:$0]  %s468_s0, 128, %s17_s27, [#allocation3]  }
  0x23   :  { %s372_s14 = scalar_lea.hbm %s470_s2, 128 }
  0x24   :  { %p373_p2 = scmp.ne.s32.totalorder %s470_s2, %s372_s14  ;;  %p376_p3 = scmp.lt.u32.totalorder %s372_s14, %s470_s2 }
  0x26   :  { %p378_p4 = pnand %p376_p3, %p373_p2 }
  0x28   :  { %381 = shalt.err (!%p378_p4)
}
  0x29   :  { %s382_s19 = scalar_lea.vmem %s39_s29, 128  ;;  %p387_p6 = scmp.lt.s32.totalorder %s39_s29, %s39_s29 }
  0x2a   :  { %p383_p5 = scmp.ne.s32.totalorder %s39_s29, %s382_s19  ;;  %p388_p7 = scmp.lt.s32.totalorder %s382_s19, %s382_s19 }
  0x2c   :  { %p389_p8 = por %p388_p7, %p387_p6 }
  0x2e   :  { %p390_p9 = pnand %p389_p8, %p383_p5 }
  0x30   :  { %393 = shalt.err (!%p390_p9)
}
  0x31   :  { %41 = dma.hbm_to_vmem [thread:$0]  %s470_s2, 128, %s39_s29, [#allocation5]  }
  0x32   :  { %394 = dma.done.wait [#allocation3], 128  }
  0x33   :  { %395 = vsyncadd [#allocation3], 4294967168 }
  0x34   :  { %396 = dma.done.wait [#allocation5], 896  }
  0x35   :  { %397 = vsyncadd [#allocation5], 4294966400  ;;  %v403_v0 = vmov 0.0   ;;  %vm404_vm0 = vmmov 0   ;;  %v322_v1 = vld [vmem:[#allocation4] sm:$0xff]   ;;  %v323_v2 = vld [vmem:[#allocation4 + $0x8] sm:$0xff]   ;;  %v59_v8 = vlaneseq }
  0x36   :  { %291 = vmatprep.subr.bf16.mxu0 %v403_v0  ;;  %295 = vmatprep.mubr.msk.bf16.mxu0 %vm404_vm0, %v403_v0  ;;  %v53_v3 = vld [vmem:[#allocation2] sm:$0xff]  ;;  %vm75_vm1 = vcmask 261120   ;;  %v324_v5 = vld [vmem:[#allocation4 + $0x10] sm:$0xff]   ;;  %v326_v7 = vld [vmem:[#allocation4 + $0x20] sm:$0xff]   ;;  %vm265_vm2 = vcmask 7168  }
  0x37   :  { %299 = vmatprep.subr.bf16.mxu1 %v403_v0  ;;  %303 = vmatprep.mubr.msk.bf16.mxu1 %vm404_vm0, %v403_v0  ;;  %v58_v4 = vpack.c.bf16 %v53_v3, %v53_v3  ;;  %v325_v6 = vld [vmem:[#allocation4 + $0x18] sm:$0xff]   ;;  %v60_v9 = vshrl.u32 %v59_v8, 7  ;;  %v52_v11 = vld [vmem:[#allocation6] sm:$0x1f]  ;;  %v327_v20 = vld [vmem:[#allocation4 + $0x28] sm:$0xff]  }
  0x38   :  { %292 = vmatpush3.bf16.msra.mxu0 %v322_v1  ;;  %300 = vmatpush3.bf16.msra.mxu1 %v324_v5 }
  0x39   :  { %293 = vmatprep.subr.bf16.mxu0 %v403_v0  ;;  %301 = vmatprep.subr.bf16.mxu1 %v403_v0  ;;  %v61_v10 = vsub.s32 0, %v60_v9  ;;  %v128_v21 = vsub.s32 1, %v60_v9  ;;  %v194_v30 = vsub.s32 2, %v60_v9  ;;  %v254_v32 = vsub.s32 3, %v60_v9 }
  0x3a   :  { %v262_v42 = vsub.s32 4, %v60_v9 }
  0x3b   :  { %v62_v12 = vrot.slane %v52_v11, %v61_v10  ;;  %v129_v22 = vrot.slane %v52_v11, %v128_v21  ;;  %v195_v31 = vrot.slane %v52_v11, %v194_v30  ;;  %v255_v36 = vrot.slane %v52_v11, %v254_v32 }
  0x3c   :  { %294 = vmatpush3.bf16.msra.mxu0 %v323_v2  ;;  %302 = vmatpush3.bf16.msra.mxu1 %v325_v6  ;;  %v263_v43 = vrot.slane %v52_v11, %v262_v42 }
  0x3d   :  { %307 = vmatprep.subr.bf16.mxu0 %v403_v0 }
  0x3f   :  { %296 = vmatmul.mubr.msk.bf16.vlgmr.msra.gmra.mrb[0].mxu0 %vm75_vm1, %v58_v4 }
  0x40   :  { %311 = vmatprep.mubr.msk.bf16.mxu0 %vm404_vm0, %v403_v0  ;;  %308 = vmatpush3.bf16.msra.mxu0 %v326_v7 }
  0x41   :  { %309 = vmatprep.subr.bf16.mxu0 %v403_v0 }
  0x44   :  { %310 = vmatpush3.bf16.msra.mxu0 %v327_v20 }
 0x112   :  { %v113_v13 = vpop.f32.mrb[0].mxu0 }
 0x113   :  { %v114_v14 = vadd.f32 %v113_v13, %v62_v12  ;;  %v297_v15 = vpop.f32.mrb[1].mxu0 }
 0x114   :  { %v116_v16 = vpop.f32.mrb[2].mxu0 }
 0x115   :  { %v119_v17 = vmax.f32 %v114_v14, 0.0  ;;  %v298_v18 = vpop.f32.mrb[3].mxu0 }
 0x117   :  { %v125_v19 = vpack.c.bf16 %v119_v17, %v119_v17 }
 0x119   :  { %304 = vmatmul.mubr.msk.bf16.vlgmr.msra.gmra.mrb[0].mxu1 %vm75_vm1, %v125_v19 }
 0x1ec   :  { %v179_v23 = vpop.f32.mrb[0].mxu1 }
 0x1ed   :  { %v180_v24 = vadd.f32 %v179_v23, %v129_v22  ;;  %v305_v25 = vpop.f32.mrb[1].mxu1 }
 0x1ee   :  { %v182_v26 = vpop.f32.mrb[2].mxu1 }
 0x1ef   :  { %v185_v27 = vmax.f32 %v180_v24, 0.0  ;;  %v306_v28 = vpop.f32.mrb[3].mxu1 }
 0x1f1   :  { %v191_v29 = vpack.c.bf16 %v185_v27, %v185_v27 }
 0x1f3   :  { %312 = vmatmul.mubr.msk.bf16.vlgmr.msra.gmra.mrb[4].mxu0 %vm75_vm1, %v191_v29 }
 0x2c6   :  { %v245_v33 = vpop.f32.mrb[4].mxu0 }
 0x2c7   :  { %v246_v34 = vadd.f32 %v245_v33, %v195_v31  ;;  %v313_v35 = vpop.f32.mrb[5].mxu0 }
 0x2c8   :  { %v248_v37 = vpop.f32.mrb[6].mxu0 }
 0x2c9   :  { %v251_v38 = vmax.f32 %v246_v34, 0.0  ;;  %v314_v39 = vpop.f32.mrb[7].mxu0 }
 0x2cb   :  { %v256_v40 = vmul.f32 %v255_v36, %v251_v38 }
 0x2cd   :  { %v257_v41 = vsel %vm75_vm1, %v256_v40, 0.0 }
 0x2ce   :  { %258 = vadd.xlane.f32.xlu0 %v257_v41 }
 0x35b   :  { %v259_v44 = vpop.xlane.xlu0 %258 }
 0x35c   :  { %v264_v45 = vadd.f32 %v263_v43, %v259_v44 }
 0x35e   :  { %266 = vst.msk [vmem:[%s471_s3] sm:$0xff] %vm265_vm2, %v264_v45 }
 0x35f   :  { %271 = vsyncpa [#allocation3], 1 }
 0x360   :  { %272 = vsyncpa [#allocation5], 1 }

</bundles_post_ra>
